<compile_context>
chip_gen: v7x
topology: tpu7x:2x2x1
jax: 0.10.0
libtpu: 0.0.40
codegen_flags: <defaults>
</compile_context>

<pallas_src>
import numpy as np
import jax
import jax.numpy as jnp
from jax import lax
from jax.experimental import pallas as pl
from jax.experimental.pallas import tpu as pltpu


# ---------------------------------------------------------------------------
# Schedule construction (plain numpy glue; matches the PyTorch __init__).
# ---------------------------------------------------------------------------
def cosine_beta_schedule(num_timesteps: int, s: float = 0.008,
                         raise_to_power: float = 1) -> np.ndarray:
    steps = num_timesteps + 2
    x = np.linspace(0, steps, steps)
    alphas_cumprod = np.cos((x / steps + s) / (1 + s) * np.pi * 0.5) ** 2
    alphas_cumprod = alphas_cumprod / alphas_cumprod[0]
    betas = 1 - alphas_cumprod[1:] / alphas_cumprod[:-1]
    betas = np.clip(betas, a_min=0, a_max=0.999)
    alphas = 1.0 - betas
    alphas_cumprod = np.cumprod(alphas, axis=0)
    if raise_to_power != 1:
        alphas_cumprod = np.power(alphas_cumprod, raise_to_power)
    return alphas_cumprod


def clip_noise_schedule(alphas2: np.ndarray, clip_value: float = 0.001) -> np.ndarray:
    alphas2 = np.concatenate([np.ones(1), alphas2], axis=0)
    alphas_step = alphas2[1:] / alphas2[:-1]
    alphas_step = np.clip(alphas_step, a_min=clip_value, a_max=1.0)
    alphas2 = np.cumprod(alphas_step, axis=0)
    return alphas2


def polynomial_schedule(num_timesteps: int, s: float = 1e-4,
                        power: float = 3.0) -> np.ndarray:
    steps = num_timesteps + 1
    x = np.linspace(0, steps, steps)
    alphas2 = (1 - np.power(x / steps, power)) ** 2
    alphas2 = clip_noise_schedule(alphas2, clip_value=0.001)
    precision = 1 - 2 * s
    alphas2 = precision * alphas2 + s
    return alphas2


def build_gamma(noise_schedule: str, num_timesteps: int,
                noise_precision: float) -> np.ndarray:
    if noise_schedule == "cosine":
        alphas2 = cosine_beta_schedule(num_timesteps)
    elif "polynomial" in noise_schedule:
        splits = noise_schedule.split("_")
        assert len(splits) == 2
        power = float(splits[1])
        alphas2 = polynomial_schedule(num_timesteps, s=noise_precision, power=power)
    else:
        raise ValueError(noise_schedule)
    sigmas2 = 1 - alphas2
    log_alphas2 = np.log(alphas2)
    log_sigmas2 = np.log(sigmas2)
    log_alphas2_to_sigmas2 = log_alphas2 - log_sigmas2
    gamma = (-log_alphas2_to_sigmas2).astype(np.float32)   # (num_timesteps + 1,)
    return gamma


# ---------------------------------------------------------------------------
# Pallas kernel: table lookup via (1, Tpad) lane-iota compare + select + reduce.
# ---------------------------------------------------------------------------
def _make_lookup_kernel(timesteps: int):
    def gamma_lookup_kernel(t_ref, gamma_ref, out_ref):
        # t_ref:     (TILE_B, 1)  float32
        # gamma_ref: (1, Tpad)    float32  (padded gamma table, lane-dense)
        # out_ref:   (TILE_B, 1)  float32
        t = t_ref[...]                                               # (TILE_B, 1)
        idx = jnp.round(t * jnp.float32(timesteps)).astype(jnp.int32)
        idx = jnp.clip(idx, 0, timesteps)                            # guard OOB t

        tpad = gamma_ref.shape[1]
        # (1, Tpad) lane iota; broadcasting against idx (TILE_B, 1) builds the
        # one-hot condition without materializing a (TILE_B, Tpad) iota.
        col = lax.broadcasted_iota(jnp.int32, (1, tpad), 1)
        picked = jnp.where(col == idx, gamma_ref[...], jnp.float32(0.0))
        out_ref[...] = jnp.sum(picked, axis=1, keepdims=True)        # XLU lane reduce

    return gamma_lookup_kernel


class PredefinedNoiseSchedulePallas:
    """JAX/Pallas counterpart of the PyTorch PredefinedNoiseSchedule."""

    # Single-block cutoff: below this, one block == the whole batch (no grid,
    # no batch padding, no output slicing).
    SINGLE_TILE_B = 512
    # Large-batch tile ceiling: amortizes the ~0.35 us per-grid-step pipeline
    # cost on single-TC parts while keeping the (TILE_B, Tpad) select
    # intermediate at ~4 MiB.
    MAX_TILE_B = 1024

    def __init__(self, noise_schedule: str, num_timesteps: int,
                 noise_precision: float):
        self.timesteps = num_timesteps
        gamma = build_gamma(noise_schedule, num_timesteps, noise_precision)
        # Pad table to a lane multiple (128), presented as a [1, Tpad] row.
        t1 = gamma.shape[0]
        tpad = ((t1 + 127) // 128) * 128
        gamma_padded = np.zeros((1, tpad), dtype=np.float32)
        gamma_padded[0, :t1] = gamma
        self.gamma_table = jnp.asarray(gamma_padded)    # (1, Tpad) float32
        self.gamma_np = gamma                           # for reference checks
        self._kernel = _make_lookup_kernel(num_timesteps)

    @staticmethod
    def _round_up(x: int, m: int) -> int:
        return ((x + m - 1) // m) * m

    def _pick_tile_b(self, b: int) -> int:
        if b <= self.SINGLE_TILE_B:
            # Block equals the full array: exact, no ragged tail, no padding.
            return b
        # >= 2 grid steps so the "parallel" axis feeds both v7x TensorCores;
        # capped at MAX_TILE_B for single-TC v5e/v6e amortization.
        return min(self.MAX_TILE_B, self._round_up((b + 1) // 2, 8))

    def __call__(self, t: jnp.ndarray) -> jnp.ndarray:
        # t: (B, 1) float -> (B, 1) float32
        t = t.astype(jnp.float32)
        b = t.shape[0]
        tpad = self.gamma_table.shape[1]

        tile_b = self._pick_tile_b(b)
        grid = pl.cdiv(b, tile_b)   # ragged last block handled by Pallas masking

        out = pl.pallas_call(
            self._kernel,
            out_shape=jax.ShapeDtypeStruct((b, 1), jnp.float32),
            grid_spec=pltpu.PrefetchScalarGridSpec(
                num_scalar_prefetch=0,
                grid=(grid,),
                in_specs=[
                    pl.BlockSpec((tile_b, 1), lambda i: (i, 0)),
                    # Constant block index -> the 4 KiB table is DMAed once and
                    # kept resident across grid steps (no per-step refetch).
                    pl.BlockSpec((1, tpad), lambda i: (0, 0)),
                ],
                out_specs=pl.BlockSpec((tile_b, 1), lambda i: (i, 0)),
            ),
            compiler_params=pltpu.CompilerParams(
                dimension_semantics=("parallel",),
                # Explicit limit so the 1024-row tile path also fits v5e's
                # smaller (16 MiB) scoped-VMEM default.
                vmem_limit_bytes=32 * 1024 * 1024,
            ),
        )(t, self.gamma_table)
        return out


# ---------------------------------------------------------------------------
# Demo / self-test
# ---------------------------------------------------------------------------
if __name__ == "__main__":
    num_timesteps = 1000
    noise_precision = 1e-5
    schedule = PredefinedNoiseSchedulePallas(
        noise_schedule="polynomial_2",
        num_timesteps=num_timesteps,
        noise_precision=noise_precision,
    )

    key = jax.random.PRNGKey(0)

    def reference(t_np: np.ndarray) -> np.ndarray:
        idx = np.rint(t_np * num_timesteps).astype(np.int64)
        idx = np.clip(idx, 0, num_timesteps)
        return schedule.gamma_np[idx]

    # Small batch (typical diffusion-sampler case): single exact block.
    k1, k2 = jax.random.split(key)
    B_small = 8
    t_small = jax.random.uniform(k1, (B_small, 1), dtype=jnp.float32)
    out_small = jax.block_until_ready(schedule(t_small))
    np.testing.assert_allclose(np.asarray(out_small), reference(np.asarray(t_small)),
                               rtol=1e-6, atol=1e-6)
    assert out_small.shape == (B_small, 1) and out_small.dtype == jnp.float32

    # Larger, non-tile-aligned batch: exercises the 2-step parallel grid and
    # the ragged (masked) last block -- no wrapper pad / slice involved.
    B_big = 1037
    t_big = jax.random.uniform(k2, (B_big, 1), dtype=jnp.float32)
    out_big = jax.block_until_ready(schedule(t_big))
    np.testing.assert_allclose(np.asarray(out_big), reference(np.asarray(t_big)),
                               rtol=1e-6, atol=1e-6)
    assert out_big.shape == (B_big, 1) and out_big.dtype == jnp.float32

    # Edge values: t exactly 0 and 1 (clamp path), non-multiple-of-8 batch.
    t_edge = jnp.array([[0.0], [1.0], [0.5], [0.9995]], dtype=jnp.float32)
    out_edge = jax.block_until_ready(schedule(t_edge))
    np.testing.assert_allclose(np.asarray(out_edge), reference(np.asarray(t_edge)),
                               rtol=1e-6, atol=1e-6)
    assert out_edge.shape == (4, 1)

    print("KERNEL_OK")
</pallas_src>

<mosaic_0001>
module attributes {stable_mosaic.version = 11 : i64} {
  func.func @gamma_lookup_kernel(%arg0: i32, %arg1: memref<8x1xf32, #tpu.memory_space<vmem>>, %arg2: memref<1x1024xf32, #tpu.memory_space<vmem>>, %arg3: memref<8x1xf32, #tpu.memory_space<vmem>>) attributes {dimension_semantics = [#tpu.dimension_semantics<parallel>], iteration_bounds = array<i64: 1>, scalar_prefetch = 0 : i64, scratch_operands = 0 : i64, tpu.core_type = #tpu.core_type<tc>, window_params = [{transform_indices = @transform_0, window_bounds = array<i64: 8, 1>}, {pipeline_mode = #tpu.pipeline_mode<synchronous>, transform_indices = @transform_1, window_bounds = array<i64: 1, 1024>}, {transform_indices = @transform_2, window_bounds = array<i64: 8, 1>}]} {
    %c0 = arith.constant 0 : index
    %c0_0 = arith.constant 0 : index
    %0 = vector.load %arg1[%c0, %c0_0] : memref<8x1xf32, #tpu.memory_space<vmem>>, vector<8x1xf32>
    %cst = arith.constant 1.000000e+03 : f32
    %1 = vector.broadcast %cst : f32 to vector<8x1xf32>
    %2 = arith.mulf %0, %1 : vector<8x1xf32>
    %3 = math.roundeven %2 : vector<8x1xf32>
    %4 = arith.fptosi %3 : vector<8x1xf32> to vector<8x1xi32>
    %c0_i32 = arith.constant 0 : i32
    %c1000_i32 = arith.constant 1000 : i32
    %5 = vector.broadcast %c0_i32 : i32 to vector<8x1xi32>
    %6 = arith.maxsi %5, %4 : vector<8x1xi32>
    %7 = vector.broadcast %c1000_i32 : i32 to vector<8x1xi32>
    %8 = arith.minsi %7, %6 : vector<8x1xi32>
    %9 = tpu.iota {dimensions = array<i32: 1>} : vector<1x1024xi32>
    %10 = vector.broadcast %9 : vector<1x1024xi32> to vector<8x1024xi32>
    %11 = vector.broadcast %8 : vector<8x1xi32> to vector<8x1024xi32>
    %12 = arith.cmpi eq, %10, %11 : vector<8x1024xi32>
    %c0_1 = arith.constant 0 : index
    %c0_2 = arith.constant 0 : index
    %13 = vector.load %arg2[%c0_1, %c0_2] : memref<1x1024xf32, #tpu.memory_space<vmem>>, vector<1x1024xf32>
    %cst_3 = arith.constant 0.000000e+00 : f32
    %14 = vector.shape_cast %13 : vector<1x1024xf32> to vector<1x1024xf32>
    %15 = vector.broadcast %14 : vector<1x1024xf32> to vector<8x1024xf32>
    %16 = vector.broadcast %cst_3 : f32 to vector<8x1024xf32>
    %17 = arith.select %12, %15, %16 : vector<8x1024xi1>, vector<8x1024xf32>
    %cst_4 = arith.constant dense<0.000000e+00> : vector<8xf32>
    %18 = vector.multi_reduction <add>, %17, %cst_4 [1] : vector<8x1024xf32> to vector<8xf32>
    %19 = vector.shape_cast %18 : vector<8xf32> to vector<8x1xf32>
    %c0_5 = arith.constant 0 : index
    %c0_6 = arith.constant 0 : index
    %20 = vector.load %arg3[%c0_5, %c0_6] : memref<8x1xf32, #tpu.memory_space<vmem>>, vector<8x1xf32>
    tpu.vector_store %arg3[%c0_5, %c0_6], %19 {strides = array<i32>} : memref<8x1xf32, #tpu.memory_space<vmem>>, vector<8x1xf32>,
    return
  }
  func.func @transform_0(%arg0: i32) -> (i32, i32) {
    %c0_i32 = arith.constant 0 : i32
    %c0_i32_0 = arith.constant 0 : i32
    return %arg0, %c0_i32 : i32, i32
  }
  func.func @transform_1(%arg0: i32) -> (i32, i32) {
    %c0_i32 = arith.constant 0 : i32
    %c0_i32_0 = arith.constant 0 : i32
    %c0_i32_1 = arith.constant 0 : i32
    return %c0_i32, %c0_i32_0 : i32, i32
  }
  func.func @transform_2(%arg0: i32) -> (i32, i32) {
    %c0_i32 = arith.constant 0 : i32
    %c0_i32_0 = arith.constant 0 : i32
    return %arg0, %c0_i32 : i32, i32
  }
}

</mosaic_0001>

<bundles_post_ra>
// kernel: tpu_custom_call.1
= control target key start
LH: loop header
LB: loop body
LE: loop exit
PB: predicated region body
PF: predicated region fallthrough
CT: control target
= control target key end

     0   :  { %v108_v0 = vmov 0   ;;  %v18_v6 = vlaneseq  ;;  %vm97_vm10 = vcmask 7168   ;;  %s133_s0 = inlined_call_operand.vmem [shape: f32[8,1], index: 0, kind: input, shape index: {}]   ;;  %s134_s1 = inlined_call_operand.vmem [shape: f32[1,1024], index: 1, kind: input, shape index: {}]   ;;  %s135_s2 = inlined_call_operand.vmem [shape: f32[8,1], index: 2, kind: output, shape index: {}]  }
   0x1   :  { %107 = vset.pattern.permute.xlu0 %v108_v0  ;;  %v11_v1 = vld [vmem:[%s133_s0] sm:$0xff] }
   0x2   :  { %v12_v2 = vmul.f32 1000.0, %v11_v1  ;;  %v41_v7 = vshrl.u32 %v18_v6, 7  ;;  %v19_v8 = vand.u32 127, %v18_v6  ;;  %v38_v11 = vld [vmem:[%s134_s1] sm:$0xff] }
   0x4   :  { %v105_v3 = vcvt.f32.s32 %v12_v2  ;;  %v42_v9 = vsub.s32 0, %v41_v7  ;;  %v46_v10 = vsub.s32 1, %v41_v7  ;;  %v20_v12 = vadd.s32 128, %v19_v8 }
   0x5   :  { %v50_v13 = vsub.s32 2, %v41_v7  ;;  %v21_v14 = vadd.s32 256, %v19_v8  ;;  %v54_v18 = vsub.s32 3, %v41_v7  ;;  %v22_v19 = vadd.s32 384, %v19_v8 }
   0x6   :  { %vm14_vm0 = vcmp.gt.s32.totalorder %v105_v3, 0  ;;  %v43_v15 = vrot.slane %v38_v11, %v42_v9  ;;  %v47_v16 = vrot.slane %v38_v11, %v46_v10  ;;  %v58_v21 = vsub.s32 4, %v41_v7 }
   0x7   :  { %v15_v4 = vsel %vm14_vm0, %v105_v3, 0  ;;  %v51_v20 = vrot.slane %v38_v11, %v50_v13  ;;  %v23_v22 = vadd.s32 512, %v19_v8  ;;  %v55_v25 = vrot.slane %v38_v11, %v54_v18 }
   0x8   :  { %vm16_vm1 = vcmp.lt.s32.totalorder %v15_v4, 1000  ;;  %v62_v26 = vsub.s32 5, %v41_v7  ;;  %v24_v27 = vadd.s32 640, %v19_v8  ;;  %v59_v29 = vrot.slane %v38_v11, %v58_v21 }
   0x9   :  { %v17_v5 = vsel %vm16_vm1, %v15_v4, 1000  ;;  %v66_v30 = vsub.s32 6, %v41_v7  ;;  %v25_v32 = vadd.s32 768, %v19_v8  ;;  %v70_v35 = vsub.s32 7, %v41_v7 }
   0xa   :  { %28 = vperm.xlu0 %107, %v17_v5   ;;  %v63_v34 = vrot.slane %v38_v11, %v62_v26  ;;  %v26_v37 = vadd.s32 896, %v19_v8 }
   0xb   :  { %v67_v39 = vrot.slane %v38_v11, %v66_v30  ;;  %v71_v42 = vrot.slane %v38_v11, %v70_v35 }
  0x89   :  { %v29_v17 = vpop.permute.xlu0 %28 }
  0x8a   :  { %vm30_vm2 = vcmp.eq.s32.totalorder %v19_v8, %v29_v17  ;;  %vm31_vm3 = vcmp.eq.s32.totalorder %v20_v12, %v29_v17  ;;  %vm32_vm4 = vcmp.eq.s32.totalorder %v21_v14, %v29_v17  ;;  %vm33_vm5 = vcmp.eq.s32.totalorder %v22_v19, %v29_v17 }
  0x8b   :  { %v80_v23 = vsel %vm30_vm2, %v43_v15, 0.0  ;;  %v81_v24 = vsel %vm31_vm3, %v47_v16, 0.0  ;;  %v82_v31 = vsel %vm32_vm4, %v51_v20, 0.0  ;;  %vm34_vm6 = vcmp.eq.s32.totalorder %v23_v22, %v29_v17 }
  0x8c   :  { %v88_v28 = vadd.f32 %v81_v24, %v80_v23  ;;  %v83_v36 = vsel %vm33_vm5, %v55_v25, 0.0  ;;  %vm35_vm7 = vcmp.eq.s32.totalorder %v24_v27, %v29_v17  ;;  %v84_v40 = vsel %vm34_vm6, %v59_v29, 0.0 }
  0x8d   :  { %vm36_vm8 = vcmp.eq.s32.totalorder %v25_v32, %v29_v17  ;;  %v85_v43 = vsel %vm35_vm7, %v63_v34, 0.0  ;;  %vm37_vm9 = vcmp.eq.s32.totalorder %v26_v37, %v29_v17 }
  0x8e   :  { %v89_v33 = vadd.f32 %v88_v28, %v82_v31  ;;  %v86_v45 = vsel %vm36_vm8, %v67_v39, 0.0  ;;  %v87_v47 = vsel %vm37_vm9, %v71_v42, 0.0 }
  0x90   :  { %v90_v38 = vadd.f32 %v89_v33, %v83_v36 }
  0x92   :  { %v91_v41 = vadd.f32 %v90_v38, %v84_v40 }
  0x94   :  { %v92_v44 = vadd.f32 %v91_v41, %v85_v43 }
  0x96   :  { %v93_v46 = vadd.f32 %v92_v44, %v86_v45 }
  0x98   :  { %v94_v48 = vadd.f32 %v93_v46, %v87_v47 }
  0x9a   :  { %95 = vadd.xlane.f32.xlu0 %v94_v48 }
 0x127   :  { %v96_v49 = vpop.xlane.xlu0 %95 }
 0x128   :  { %98 = vst.msk [vmem:[%s135_s2] sm:$0xff] %vm97_vm10, %v96_v49 }

</bundles_post_ra>
